<compile_context>
chip_gen: v7x
topology: tpu7x:2x2x1
jax: 0.10.0
libtpu: 0.0.40
codegen_flags: <defaults>
</compile_context>

<pallas_src>
import jax
import jax.numpy as jnp
from jax.experimental import pallas as pl
from jax.experimental.pallas import tpu as pltpu


def _round_up(n, m):
    return ((n + m - 1) // m) * m


# --------------------------------------------------------------------------- #
# Kernel
# --------------------------------------------------------------------------- #
def inception_a_kernel(x_ref, wA_ref, bA_ref, wB_ref, bB_ref, o_ref):
    zk = wB_ref.shape[0]              # padded width of branch3 intermediate (e.g. 512)
    n12 = wA_ref.shape[1] - zk        # padded width of branch1|branch2 slabs (e.g. 256)

    x = x_ref[...]                    # [TB, 3*L]

    # Fused matmul: branch1 (k=1), branch2 (k=5), branch3 conv#1 (k=3) share the LHS x.
    y = jnp.dot(x, wA_ref[...], preferred_element_type=jnp.float32) + bA_ref[...]
    y = jnp.maximum(y, 0.0)           # [TB, n12 + zk]

    # Branch3 conv#2 (5 -> 1 channel, k=5) on the 128-aligned z slab.
    z = y[:, n12:]                    # [TB, zk], aligned slice (no lane rotation)
    y3 = jnp.dot(z, wB_ref[...], preferred_element_type=jnp.float32) + bB_ref[...]
    y3 = jnp.maximum(y3, 0.0)         # [TB, 128]

    # Lane-aligned, unmasked stores: [branch1 slab | branch2 slab | branch3 slab].
    o_ref[:, :n12] = y[:, :n12].astype(o_ref.dtype)
    o_ref[:, n12:] = y3.astype(o_ref.dtype)


# --------------------------------------------------------------------------- #
# Wrapper: lower convs to dense lane-slab operators, tile the batch, call kernel
# --------------------------------------------------------------------------- #
def conv1d_to_dense(w, L):
    """Lower a stride-1, 'same'-padded Conv1d weight [Cout, Cin, K] to a dense matrix
    M of shape [Cin*L, Cout*L] (feature index = channel*L + position) such that
    x_flat @ M equals the PyTorch conv1d output flattened the same way."""
    Cout, Cin, K = w.shape
    P = (K - 1) // 2
    l_in = jnp.arange(L)[:, None]
    l_out = jnp.arange(L)[None, :]
    k = l_in - l_out + P                                            # [L, L]
    valid = (k >= 0) & (k < K)
    k = jnp.clip(k, 0, K - 1)
    taps = jnp.where(valid[None, None], w[:, :, k], 0.0)            # [Cout, Cin, L, L]
    return jnp.transpose(taps, (1, 2, 0, 3)).reshape(Cin * L, Cout * L)


def _bias_row(b, L, width):
    v = jnp.repeat(b, L)                                            # [Cout*L]
    return jnp.pad(v, (0, width - v.shape[0]))[None, :]             # [1, width]


def _pad_cols(m, width):
    return jnp.pad(m, ((0, 0), (0, width - m.shape[1])))


def inception_a_forward(x, params, *, tile_b=512):
    """x: [B, 3, L] float32 (post-SPP, post-transpose conv-branch input). Returns [B, L, 3]."""
    B, C, L = x.shape
    assert C == 3
    F = C * L
    SLAB = _round_up(L, 128)             # per-branch output slab (lane-aligned)
    ZW = _round_up(5 * L, 128)           # branch3 intermediate slab (lane-aligned)
    OW = 3 * SLAB                        # packed output width

    # ---- pack conv branches into dense, lane-slab-aligned operators (tiny) ----
    wA = jnp.concatenate([
        _pad_cols(conv1d_to_dense(params["w1"], L), SLAB),
        _pad_cols(conv1d_to_dense(params["w2"], L), SLAB),
        _pad_cols(conv1d_to_dense(params["w3a"], L), ZW)], axis=1)      # [3L, 2*SLAB+ZW]
    bA = jnp.concatenate([
        _bias_row(params["b1"], L, SLAB),
        _bias_row(params["b2"], L, SLAB),
        _bias_row(params["b3a"], L, ZW)], axis=1)                       # [1, 2*SLAB+ZW]
    wB = jnp.pad(conv1d_to_dense(params["w3b"], L),
                 ((0, ZW - 5 * L), (0, SLAB - L)))                      # [ZW, SLAB]
    bB = _bias_row(params["b3b"], L, SLAB)                              # [1, SLAB]

    # ---- batch tiling: pad B so arbitrary batch sizes work, tiles multiple of 8 ----
    tile_b = max(8, min(_round_up(tile_b, 8), _round_up(B, 8)))
    Bp = _round_up(B, tile_b)
    x_flat = x.reshape(B, F)
    if Bp != B:
        x_flat = jnp.pad(x_flat, ((0, Bp - B), (0, 0)))

    def full(arr):
        return pl.BlockSpec(arr.shape, lambda i: (0, 0))

    flops = 2 * Bp * (F * wA.shape[1] + wB.shape[0] * wB.shape[1])
    bytes_accessed = 4 * (Bp * F + Bp * OW + wA.size + bA.size + wB.size + bB.size)

    out = pl.pallas_call(
        inception_a_kernel,
        out_shape=jax.ShapeDtypeStruct((Bp, OW), jnp.float32),
        grid_spec=pltpu.PrefetchScalarGridSpec(
            num_scalar_prefetch=0,
            grid=(Bp // tile_b,),
            in_specs=[pl.BlockSpec((tile_b, F), lambda i: (i, 0)),
                      full(wA), full(bA), full(wB), full(bB)],
            out_specs=pl.BlockSpec((tile_b, OW), lambda i: (i, 0)),
        ),
        compiler_params=pltpu.CompilerParams(
            dimension_semantics=("parallel",),
        ),
        cost_estimate=pl.CostEstimate(flops=flops, transcendentals=0,
                                      bytes_accessed=bytes_accessed),
    )(x_flat, wA, bA, wB, bB)

    # [B, 3*SLAB] lane-padded channel-major -> [B, L, 3]  (wrapper-side layout plumbing)
    return out[:B].reshape(B, C, SLAB)[:, :, :L].transpose(0, 2, 1)


# --------------------------------------------------------------------------- #
# Parameter init (PyTorch Conv1d style) and pure-JAX reference
# --------------------------------------------------------------------------- #
def init_params(key):
    """Deterministic PyTorch-Conv1d-style init: U(-1/sqrt(fan_in), 1/sqrt(fan_in))."""
    shapes = {"w1": (1, 3, 1), "b1": (1,),
              "w2": (1, 3, 5), "b2": (1,),
              "w3a": (5, 3, 3), "b3a": (5,),
              "w3b": (1, 5, 5), "b3b": (1,)}
    fan_in = {"1": 3 * 1, "2": 3 * 5, "3a": 3 * 3, "3b": 5 * 5}
    params = {}
    for tag in ["1", "2", "3a", "3b"]:
        key, kw, kb = jax.random.split(key, 3)
        bound = 1.0 / (fan_in[tag] ** 0.5)
        params[f"w{tag}"] = jax.random.uniform(
            kw, shapes[f"w{tag}"], minval=-bound, maxval=bound, dtype=jnp.float32)
        params[f"b{tag}"] = jax.random.uniform(
            kb, shapes[f"b{tag}"], minval=-bound, maxval=bound, dtype=jnp.float32)
    return params


def _ref_conv1d(x, w, b, pad):
    """PyTorch-semantics Conv1d (cross-correlation), stride 1."""
    B, Cin, L = x.shape
    Cout, _, K = w.shape
    xp = jnp.pad(x, ((0, 0), (0, 0), (pad, pad)))
    y = jnp.broadcast_to(b[None, :, None], (B, Cout, L)).astype(jnp.float32)
    for k in range(K):
        y = y + jnp.einsum("oi,bil->bol", w[:, :, k], xp[:, :, k:k + L])
    return y


def reference_forward(x, params):
    relu = lambda v: jnp.maximum(v, 0.0)
    t = lambda v: jnp.transpose(v, (0, 2, 1))
    x1 = relu(_ref_conv1d(x, params["w1"], params["b1"], 0))      # [B, 1, L]
    x2 = relu(_ref_conv1d(x, params["w2"], params["b2"], 2))      # [B, 1, L]
    x3 = relu(_ref_conv1d(x, params["w3a"], params["b3a"], 1))    # [B, 5, L]
    x3 = relu(_ref_conv1d(x3, params["w3b"], params["b3b"], 2))   # [B, 1, L]
    return jnp.concatenate([t(x1), t(x2), t(x3)], axis=2)          # [B, L, 3]


if __name__ == "__main__":
    key = jax.random.PRNGKey(0)
    kp, kx = jax.random.split(key)

    params = init_params(kp)

    # Small demo shapes: post-SPP tensor [B, 3, L] with L = 1+2+...+13 = 91.
    B, C, L = 4, 3, 91
    x = jax.random.normal(kx, (B, C, L), dtype=jnp.float32)

    out = inception_a_forward(x, params, tile_b=512)
    out = jax.block_until_ready(out)

    ref = reference_forward(x, params)
    assert out.shape == (B, L, 3)
    max_diff = jnp.max(jnp.abs(out - ref))
    assert jnp.allclose(out, ref, atol=1e-4, rtol=1e-4), f"max abs diff {max_diff}"

    print("KERNEL_OK")
</pallas_src>

<mosaic_0001>
module attributes {stable_mosaic.version = 11 : i64} {
  func.func @inception_a_kernel(%arg0: i32, %arg1: memref<8x273xf32, #tpu.memory_space<vmem>>, %arg2: memref<273x768xf32, #tpu.memory_space<vmem>>, %arg3: memref<1x768xf32, #tpu.memory_space<vmem>>, %arg4: memref<512x128xf32, #tpu.memory_space<vmem>>, %arg5: memref<1x128xf32, #tpu.memory_space<vmem>>, %arg6: memref<8x384xf32, #tpu.memory_space<vmem>>) attributes {dimension_semantics = [#tpu.dimension_semantics<parallel>], iteration_bounds = array<i64: 1>, scalar_prefetch = 0 : i64, scratch_operands = 0 : i64, tpu.core_type = #tpu.core_type<tc>, window_params = [{transform_indices = @transform_0, window_bounds = array<i64: 8, 273>}, {pipeline_mode = #tpu.pipeline_mode<synchronous>, transform_indices = @transform_1, window_bounds = array<i64: 273, 768>}, {pipeline_mode = #tpu.pipeline_mode<synchronous>, transform_indices = @transform_2, window_bounds = array<i64: 1, 768>}, {pipeline_mode = #tpu.pipeline_mode<synchronous>, transform_indices = @transform_3, window_bounds = array<i64: 512, 128>}, {pipeline_mode = #tpu.pipeline_mode<synchronous>, transform_indices = @transform_4, window_bounds = array<i64: 1, 128>}, {transform_indices = @transform_5, window_bounds = array<i64: 8, 384>}]} {
    %c0 = arith.constant 0 : index
    %c0_0 = arith.constant 0 : index
    %0 = vector.load %arg1[%c0, %c0_0] : memref<8x273xf32, #tpu.memory_space<vmem>>, vector<8x273xf32>
    %c0_1 = arith.constant 0 : index
    %c0_2 = arith.constant 0 : index
    %1 = vector.load %arg2[%c0_1, %c0_2] : memref<273x768xf32, #tpu.memory_space<vmem>>, vector<273x768xf32>
    %cst = arith.constant dense<0.000000e+00> : vector<8x768xf32>
    %2 = tpu.matmul %0, %1, %cst {dimension_numbers = #tpu.dot_dimension_numbers<[1], [0], [0], [1], [0, 0, 1, 1], [], []>} : vector<8x273xf32>, vector<273x768xf32>, vector<8x768xf32> -> vector<8x768xf32>
    %c0_3 = arith.constant 0 : index
    %c0_4 = arith.constant 0 : index
    %3 = vector.load %arg3[%c0_3, %c0_4] : memref<1x768xf32, #tpu.memory_space<vmem>>, vector<1x768xf32>
    %4 = vector.broadcast %3 : vector<1x768xf32> to vector<8x768xf32>
    %5 = arith.addf %2, %4 : vector<8x768xf32>
    %cst_5 = arith.constant 0.000000e+00 : f32
    %6 = vector.broadcast %cst_5 : f32 to vector<8x768xf32>
    %7 = arith.maximumf %5, %6 : vector<8x768xf32>
    %8 = vector.extract_strided_slice %7 {offsets = [0, 256], sizes = [8, 512], strides = [1, 1]} : vector<8x768xf32> to vector<8x512xf32>
    %c0_6 = arith.constant 0 : index
    %c0_7 = arith.constant 0 : index
    %9 = vector.load %arg4[%c0_6, %c0_7] : memref<512x128xf32, #tpu.memory_space<vmem>>, vector<512x128xf32>
    %cst_8 = arith.constant dense<0.000000e+00> : vector<8x128xf32>
    %10 = tpu.matmul %8, %9, %cst_8 {dimension_numbers = #tpu.dot_dimension_numbers<[1], [0], [0], [1], [0, 0, 1, 1], [], []>} : vector<8x512xf32>, vector<512x128xf32>, vector<8x128xf32> -> vector<8x128xf32>
    %c0_9 = arith.constant 0 : index
    %c0_10 = arith.constant 0 : index
    %11 = vector.load %arg5[%c0_9, %c0_10] : memref<1x128xf32, #tpu.memory_space<vmem>>, vector<1x128xf32>
    %12 = vector.broadcast %11 : vector<1x128xf32> to vector<8x128xf32>
    %13 = arith.addf %10, %12 : vector<8x128xf32>
    %cst_11 = arith.constant 0.000000e+00 : f32
    %14 = vector.broadcast %cst_11 : f32 to vector<8x128xf32>
    %15 = arith.maximumf %13, %14 : vector<8x128xf32>
    %16 = vector.extract_strided_slice %7 {offsets = [0, 0], sizes = [8, 256], strides = [1, 1]} : vector<8x768xf32> to vector<8x256xf32>
    %c0_12 = arith.constant 0 : index
    %c0_13 = arith.constant 0 : index
    %17 = vector.load %arg6[%c0_12, %c0_13] : memref<8x384xf32, #tpu.memory_space<vmem>>, vector<8x256xf32>
    tpu.vector_store %arg6[%c0_12, %c0_13], %16 {strides = array<i32>} : memref<8x384xf32, #tpu.memory_space<vmem>>, vector<8x256xf32>,
    %c0_14 = arith.constant 0 : index
    %c256 = arith.constant 256 : index
    %18 = vector.load %arg6[%c0_14, %c256] : memref<8x384xf32, #tpu.memory_space<vmem>>, vector<8x128xf32>
    tpu.vector_store %arg6[%c0_14, %c256], %15 {strides = array<i32>} : memref<8x384xf32, #tpu.memory_space<vmem>>, vector<8x128xf32>,
    return
  }
  func.func @transform_0(%arg0: i32) -> (i32, i32) {
    %c0_i32 = arith.constant 0 : i32
    %c0_i32_0 = arith.constant 0 : i32
    return %arg0, %c0_i32 : i32, i32
  }
  func.func @transform_1(%arg0: i32) -> (i32, i32) {
    %c0_i32 = arith.constant 0 : i32
    %c0_i32_0 = arith.constant 0 : i32
    %c0_i32_1 = arith.constant 0 : i32
    return %c0_i32, %c0_i32_0 : i32, i32
  }
  func.func @transform_2(%arg0: i32) -> (i32, i32) {
    %c0_i32 = arith.constant 0 : i32
    %c0_i32_0 = arith.constant 0 : i32
    %c0_i32_1 = arith.constant 0 : i32
    return %c0_i32, %c0_i32_0 : i32, i32
  }
  func.func @transform_3(%arg0: i32) -> (i32, i32) {
    %c0_i32 = arith.constant 0 : i32
    %c0_i32_0 = arith.constant 0 : i32
    %c0_i32_1 = arith.constant 0 : i32
    return %c0_i32, %c0_i32_0 : i32, i32
  }
  func.func @transform_4(%arg0: i32) -> (i32, i32) {
    %c0_i32 = arith.constant 0 : i32
    %c0_i32_0 = arith.constant 0 : i32
    %c0_i32_1 = arith.constant 0 : i32
    return %c0_i32, %c0_i32_0 : i32, i32
  }
  func.func @transform_5(%arg0: i32) -> (i32, i32) {
    %c0_i32 = arith.constant 0 : i32
    %c0_i32_0 = arith.constant 0 : i32
    return %arg0, %c0_i32 : i32, i32
  }
}

</mosaic_0001>

<bundles_post_ra>
// kernel: tpu_custom_call.1
= control target key start
LH: loop header
LB: loop body
LE: loop exit
PB: predicated region body
PF: predicated region fallthrough
CT: control target
= control target key end

     0   :  { %10 = vsyncpa [#allocation3], 0  ;;  %s1590_s0 = inlined_call_operand.hbm [shape: f32[8,273], index: 0, kind: input, shape index: {}]   ;;  %s1591_s1 = inlined_call_operand.hbm [shape: f32[273,768], index: 1, kind: input, shape index: {}]   ;;  %s1592_s2 = inlined_call_operand.vmem [shape: f32[1,768], index: 2, kind: input, shape index: {}]   ;;  %s1593_s3 = inlined_call_operand.hbm [shape: f32[512,128], index: 3, kind: input, shape index: {}]   ;;  %s1594_s4 = inlined_call_operand.vmem [shape: f32[1,128], index: 4, kind: input, shape index: {}]   ;;  %s1595_s5 = inlined_call_operand.hbm [shape: f32[8,384], index: 5, kind: output, shape index: {}]  }
   0x1   :  { %11 = vsyncpa [#allocation6], 0 }
   0x2   :  { %12 = vsyncpa [#allocation4], 0  ;;  %s1454_s18 = smov [#allocation5]   ;;  %s1360_s22 = scalar_lea.hbm %s1591_s1, 26880 }
   0x3   :  { %s28_s19 = sshll.u32 %s1454_s18, 4  ;;  %p1361_p0 = scmp.ne.s32.totalorder %s1591_s1, %s1360_s22  ;;  %s29_s19 = int_to_ptr.vmem [resolvable:$true] %s28_s19 }
   0x4   :  { %p1364_p1 = scmp.lt.u32.totalorder %s1360_s22, %s1591_s1 }
   0x6   :  { %p1366_p2 = pnand %p1364_p1, %p1361_p0 }
   0x8   :  { %1369 = shalt.err (!%p1366_p2)
}
   0x9   :  { %s1370_s27 = scalar_lea.vmem %s29_s19, 26880  ;;  %p1375_p4 = scmp.lt.s32.totalorder %s29_s19, %s29_s19 }
   0xa   :  { %p1371_p3 = scmp.ne.s32.totalorder %s29_s19, %s1370_s27  ;;  %p1376_p5 = scmp.lt.s32.totalorder %s1370_s27, %s1370_s27 }
   0xc   :  { %p1377_p6 = por %p1376_p5, %p1375_p4 }
   0xe   :  { %p1378_p7 = pnand %p1377_p6, %p1371_p3 }
  0x10   :  { %1381 = shalt.err (!%p1378_p7)
}
  0x11   :  { %s1455_s28 = smov 768   ;;  %s1456_s29 = smov 48  }
  0x12   :  { %34 = dma.hbm_to_vmem [thread:$0]  %s1591_s1, 26880, %s29_s19, [#allocation6], %s1455_s28, %s1455_s28, %s1456_s29  }
  0x13   :  { %s1457_s7 = smov [#allocation2]   ;;  %s1458_s9 = smov [#allocation7]  }
  0x14   :  { %s19_s8 = sshll.u32 %s1457_s7, 4  ;;  %s42_s10 = sshll.u32 %s1458_s9, 4  ;;  %s20_s8 = int_to_ptr.vmem [resolvable:$true] %s19_s8  ;;  %s43_s10 = int_to_ptr.vmem [resolvable:$true] %s42_s10 }
  0x15   :  { %s1382_s13 = scalar_lea.hbm %s1590_s0, 384 }
  0x16   :  { %p1383_p8 = scmp.ne.s32.totalorder %s1590_s0, %s1382_s13  ;;  %p1386_p9 = scmp.lt.u32.totalorder %s1382_s13, %s1590_s0 }
  0x18   :  { %p1388_p10 = pnand %p1386_p9, %p1383_p8 }
  0x1a   :  { %1391 = shalt.err (!%p1388_p10)
}
  0x1b   :  { %s1392_s1 = scalar_lea.vmem %s20_s8, 384  ;;  %p1397_p12 = scmp.lt.s32.totalorder %s20_s8, %s20_s8 }
  0x1c   :  { %p1393_p11 = scmp.ne.s32.totalorder %s20_s8, %s1392_s1  ;;  %p1398_p13 = scmp.lt.s32.totalorder %s1392_s1, %s1392_s1 }
  0x1e   :  { %p1399_p0 = por %p1398_p13, %p1397_p12 }
  0x20   :  { %p1400_p1 = pnand %p1399_p0, %p1393_p11 }
  0x22   :  { %1403 = shalt.err (!%p1400_p1)
}
  0x23   :  { %22 = dma.hbm_to_vmem [thread:$0]  %s1590_s0, 384, %s20_s8, [#allocation3]  }
  0x24   :  { %s1404_s22 = scalar_lea.hbm %s1593_s3, 8192 }
  0x25   :  { %p1405_p2 = scmp.ne.s32.totalorder %s1593_s3, %s1404_s22  ;;  %p1408_p3 = scmp.lt.u32.totalorder %s1404_s22, %s1593_s3 }
  0x27   :  { %p1410_p4 = pnand %p1408_p3, %p1405_p2 }
  0x29   :  { %1413 = shalt.err (!%p1410_p4)
}
  0x2a   :  { %s1414_s27 = scalar_lea.vmem %s43_s10, 8192  ;;  %p1419_p6 = scmp.lt.s32.totalorder %s43_s10, %s43_s10 }
  0x2b   :  { %p1415_p5 = scmp.ne.s32.totalorder %s43_s10, %s1414_s27  ;;  %p1420_p7 = scmp.lt.s32.totalorder %s1414_s27, %s1414_s27 }
  0x2d   :  { %p1421_p8 = por %p1420_p7, %p1419_p6 }
  0x2f   :  { %p1422_p9 = pnand %p1421_p8, %p1415_p5 }
  0x31   :  { %1425 = shalt.err (!%p1422_p9)
}
  0x32   :  { %s1459_s0 = smov 128   ;;  %s1460_s28 = smov 8  }
  0x33   :  { %48 = dma.hbm_to_vmem [thread:$0]  %s1593_s3, 8192, %s43_s10, [#allocation6], %s1459_s0, %s1459_s0, %s1460_s28  }
  0x34   :  { %1448 = dma.done.wait [#allocation3], 384  }
  0x35   :  { %1449 = vsyncadd [#allocation3], 4294966912 }
  0x36   :  { %1450 = dma.done.wait [#allocation6], 35072  }
  0x37   :  { %1451 = vsyncadd [#allocation6], 4294932224  ;;  %v64_v0 = vld [vmem:[#allocation5 + $0x8] sm:$0xff]  ;;  %v70_v1 = vld [vmem:[#allocation5 + $0x38] sm:$0xff]  ;;  %vm309_vm0 = vcmask 1040384   ;;  %vm305_vm1 = vcmask 138240  }
  0x38   :  { %v63_v2 = vld [vmem:[#allocation5] sm:$0xff]  ;;  %v1071_v3 = vpack.c.bf16 %v70_v1, %v64_v0  ;;  %v69_v4 = vld [vmem:[#allocation5 + $0x30] sm:$0xff]  ;;  %v76_v5 = vld [vmem:[#allocation5 + $0x68] sm:$0xff]  ;;  %s1462_s8 = smov [#allocation8]  }
  0x39   :  { %v82_v6 = vld [vmem:[#allocation5 + $0x98] sm:$0xff]  ;;  %v1073_v7 = vpack.c.bf16 %v69_v4, %v63_v2  ;;  %v75_v9 = vld [vmem:[#allocation5 + $0x60] sm:$0xff]  ;;  %v81_v10 = vld [vmem:[#allocation5 + $0x90] sm:$0xff]  ;;  %s981_s9 = sshll.u32 %s1462_s8, 4  ;;  %s982_s9 = int_to_ptr.vmem [resolvable:$true] %s981_s9 }
  0x3a   :  { %v1075_v8 = vpack.c.bf16 %v82_v6, %v76_v5  ;;  %v88_v11 = vld [vmem:[#allocation5 + $0xc8] sm:$0xff]  ;;  %1072 = vmatprep.subr.bf16.mxu0 %v1071_v3  ;;  %v94_v12 = vld [vmem:[#allocation5 + $0xf8] sm:$0xff]  ;;  %v1077_v13 = vpack.c.bf16 %v81_v10, %v75_v9  ;;  %v87_v15 = vld [vmem:[#allocation5 + $0xc0] sm:$0xff]  ;;  %s1426_s10 = scalar_lea.vmem %s982_s9, 384  ;;  %p1431_p11 = scmp.lt.s32.totalorder %s982_s9, %s982_s9 }
  0x3b   :  { %1074 = vmatpush1.bf16.msra.mxu0 %v1073_v7  ;;  %v1079_v14 = vpack.c.bf16 %v94_v12, %v88_v11  ;;  %v93_v16 = vld [vmem:[#allocation5 + $0xf0] sm:$0xff]  ;;  %v100_v17 = vld [vmem:[#allocation5 + $0x128] sm:$0xff]  ;;  %v106_v18 = vld [vmem:[#allocation5 + $0x158] sm:$0xff]  ;;  %p1427_p10 = scmp.ne.s32.totalorder %s982_s9, %s1426_s10  ;;  %p1432_p12 = scmp.lt.s32.totalorder %s1426_s10, %s1426_s10 }
  0x3c   :  { %1076 = vmatprep.subr.bf16.mxu0 %v1075_v8  ;;  %v1081_v19 = vpack.c.bf16 %v93_v16, %v87_v15  ;;  %v1083_v20 = vpack.c.bf16 %v106_v18, %v100_v17  ;;  %v99_v21 = vld [vmem:[#allocation5 + $0x120] sm:$0xff]  ;;  %v105_v22 = vld [vmem:[#allocation5 + $0x150] sm:$0xff]  ;;  %v112_v23 = vld [vmem:[#allocation5 + $0x188] sm:$0xff] }
  0x3d   :  { %v118_v24 = vld [vmem:[#allocation5 + $0x1b8] sm:$0xff]  ;;  %v72_v26 = vld [vmem:[#allocation5 + $0x48] sm:$0xff]  ;;  %v65_v27 = vld [vmem:[#allocation5 + $0x10] sm:$0xff]  ;;  %v1085_v29 = vpack.c.bf16 %v105_v22, %v99_v21  ;;  %p1433_p13 = por %p1432_p12, %p1431_p11 }
  0x3e   :  { %v66_v25 = vld [vmem:[#allocation5 + $0x18] sm:$0xff]  ;;  %v71_v28 = vld [vmem:[#allocation5 + $0x40] sm:$0xff]  ;;  %v117_v31 = vld [vmem:[#allocation5 + $0x1b0] sm:$0xff]  ;;  %v1087_v34 = vpack.c.bf16 %v118_v24, %v112_v23 }
  0x3f   :  { %1078 = vmatpush1.bf16.msra.mxu0 %v1077_v13  ;;  %v111_v30 = vld [vmem:[#allocation5 + $0x180] sm:$0xff]  ;;  %v1139_v32 = vpack.c.bf16 %v72_v26, %v66_v25  ;;  %v1141_v33 = vpack.c.bf16 %v71_v28, %v65_v27  ;;  %v124_v35 = vld [vmem:[#allocation5 + $0x1e8] sm:$0xff]  ;;  %v78_v36 = vld [vmem:[#allocation5 + $0x78] sm:$0xff]  ;;  %p1434_p0 = pnand %p1433_p13, %p1427_p10 }
  0x40   :  { %1080 = vmatprep.subr.bf16.mxu0 %v1079_v14  ;;  %v84_v37 = vld [vmem:[#allocation5 + $0xa8] sm:$0xff]  ;;  %v130_v38 = vld [vmem:[#allocation5 + $0x218] sm:$0xff]  ;;  %v77_v40 = vld [vmem:[#allocation5 + $0x70] sm:$0xff]  ;;  %v1089_v43 = vpack.c.bf16 %v117_v31, %v111_v30 }
  0x41   :  { %1140 = vmatprep.subr.bf16.mxu1 %v1139_v32  ;;  %v1143_v39 = vpack.c.bf16 %v84_v37, %v78_v36  ;;  %v83_v41 = vld [vmem:[#allocation5 + $0xa0] sm:$0xff]  ;;  %v90_v44 = vld [vmem:[#allocation5 + $0xd8] sm:$0xff]  ;;  %v96_v45 = vld [vmem:[#allocation5 + $0x108] sm:$0xff]  ;;  %v1091_v47 = vpack.c.bf16 %v130_v38, %v124_v35 }
  0x42   :  { %1142 = vmatpush1.bf16.msra.mxu1 %v1141_v33  ;;  %v1145_v42 = vpack.c.bf16 %v83_v41, %v77_v40  ;;  %v89_v46 = vld [vmem:[#allocation5 + $0xd0] sm:$0xff]  ;;  %v123_v48 = vld [vmem:[#allocation5 + $0x1e0] sm:$0xff]  ;;  %v1147_v50 = vpack.c.bf16 %v96_v45, %v90_v44  ;;  %v136_v52 = vld [vmem:[#allocation5 + $0x248] sm:$0xff] }
  0x43   :  { %1082 = vmatpush1.bf16.msra.mxu0 %v1081_v19  ;;  %1144 = vmatprep.subr.bf16.mxu1 %v1143_v39  ;;  %v129_v49 = vld [vmem:[#allocation5 + $0x210] sm:$0xff]  ;;  %v95_v51 = vld [vmem:[#allocation5 + $0x100] sm:$0xff]  ;;  %v142_v53 = vld [vmem:[#allocation5 + $0x278] sm:$0xff] }
  0x44   :  { %1084 = vmatprep.subr.bf16.mxu0 %v1083_v20  ;;  %v102_v54 = vld [vmem:[#allocation5 + $0x138] sm:$0xff]  ;;  %v1149_v55 = vpack.c.bf16 %v95_v51, %v89_v46  ;;  %v108_v56 = vld [vmem:[#allocation5 + $0x168] sm:$0xff]  ;;  %v1093_v57 = vpack.c.bf16 %v129_v49, %v123_v48  ;;  %v135_v58 = vld [vmem:[#allocation5 + $0x240] sm:$0xff]  ;;  %v1095_v62 = vpack.c.bf16 %v142_v53, %v136_v52 }
  0x45   :  { %v1151_v59 = vpack.c.bf16 %v108_v56, %v102_v54  ;;  %v101_v60 = vld [vmem:[#allocation5 + $0x130] sm:$0xff]  ;;  %v107_v61 = vld [vmem:[#allocation5 + $0x160] sm:$0xff]  ;;  %v114_v0 = vld [vmem:[#allocation5 + $0x198] sm:$0xff] }
  0x46   :  { %1146 = vmatpush1.bf16.msra.mxu1 %v1145_v42  ;;  %v141_v63 = vld [vmem:[#allocation5 + $0x270] sm:$0xff]  ;;  %v120_v1 = vld [vmem:[#allocation5 + $0x1c8] sm:$0xff]  ;;  %v154_v3 = vld [vmem:[#allocation5 + $0x2d8] sm:$0xff]  ;;  %v1153_v4 = vpack.c.bf16 %v107_v61, %v101_v60 }
  0x47   :  { %1086 = vmatpush1.bf16.msra.mxu0 %v1085_v29  ;;  %1148 = vmatprep.subr.bf16.mxu1 %v1147_v50  ;;  %v148_v2 = vld [vmem:[#allocation5 + $0x2a8] sm:$0xff]  ;;  %v1097_v5 = vpack.c.bf16 %v141_v63, %v135_v58  ;;  %v147_v6 = vld [vmem:[#allocation5 + $0x2a0] sm:$0xff]  ;;  %v1155_v7 = vpack.c.bf16 %v120_v1, %v114_v0  ;;  %v113_v8 = vld [vmem:[#allocation5 + $0x190] sm:$0xff] }
  0x48   :  { %1088 = vmatprep.subr.bf16.mxu0 %v1087_v34  ;;  %v119_v9 = vld [vmem:[#allocation5 + $0x1c0] sm:$0xff]  ;;  %v1099_v10 = vpack.c.bf16 %v154_v3, %v148_v2  ;;  %v153_v11 = vld [vmem:[#allocation5 + $0x2d0] sm:$0xff]  ;;  %v126_v12 = vld [vmem:[#allocation5 + $0x1f8] sm:$0xff] }
  0x49   :  { %v132_v13 = vld [vmem:[#allocation5 + $0x228] sm:$0xff]  ;;  %v166_v15 = vld [vmem:[#allocation5 + $0x338] sm:$0xff]  ;;  %v1157_v16 = vpack.c.bf16 %v119_v9, %v113_v8  ;;  %v1101_v17 = vpack.c.bf16 %v153_v11, %v147_v6  ;;  %v159_v18 = vld [vmem:[#allocation5 + $0x300] sm:$0xff] }
  0x4a   :  { %1150 = vmatpush1.bf16.msra.mxu1 %v1149_v55  ;;  %v160_v14 = vld [vmem:[#allocation5 + $0x308] sm:$0xff]  ;;  %v1159_v19 = vpack.c.bf16 %v132_v13, %v126_v12  ;;  %v125_v20 = vld [vmem:[#allocation5 + $0x1f0] sm:$0xff]  ;;  %v131_v21 = vld [vmem:[#allocation5 + $0x220] sm:$0xff] }
  0x4b   :  { %1090 = vmatpush1.bf16.msra.mxu0 %v1089_v43  ;;  %1152 = vmatprep.subr.bf16.mxu1 %v1151_v59  ;;  %v1103_v22 = vpack.c.bf16 %v166_v15, %v160_v14  ;;  %v165_v23 = vld [vmem:[#allocation5 + $0x330] sm:$0xff]  ;;  %v138_v24 = vld [vmem:[#allocation5 + $0x258] sm:$0xff]  ;;  %v144_v25 = vld [vmem:[#allocation5 + $0x288] sm:$0xff]  ;;  %v1161_v29 = vpack.c.bf16 %v131_v21, %v125_v20 }
  0x4c   :  { %1092 = vmatprep.subr.bf16.mxu0 %v1091_v47  ;;  %v172_v26 = vld [vmem:[#allocation5 + $0x368] sm:$0xff]  ;;  %v178_v27 = vld [vmem:[#allocation5 + $0x398] sm:$0xff]  ;;  %v171_v28 = vld [vmem:[#allocation5 + $0x360] sm:$0xff]  ;;  %v1105_v30 = vpack.c.bf16 %v165_v23, %v159_v18  ;;  %v1163_v31 = vpack.c.bf16 %v144_v25, %v138_v24 }
  0x4d   :  { %v137_v32 = vld [vmem:[#allocation5 + $0x250] sm:$0xff]  ;;  %v143_v33 = vld [vmem:[#allocation5 + $0x280] sm:$0xff]  ;;  %v1107_v35 = vpack.c.bf16 %v178_v27, %v172_v26  ;;  %v150_v37 = vld [vmem:[#allocation5 + $0x2b8] sm:$0xff] }
  0x4e   :  { %1154 = vmatpush1.bf16.msra.mxu1 %v1153_v4  ;;  %v1529_v34 = vld [vmem:[#allocation2 + $0x8] sm:$0xff]  ;;  %v156_v38 = vld [vmem:[#allocation5 + $0x2e8] sm:$0xff]  ;;  %v190_v40 = vld [vmem:[#allocation5 + $0x3f8] sm:$0xff]  ;;  %v1165_v41 = vpack.c.bf16 %v143_v33, %v137_v32 }
  0x4f   :  { %1094 = vmatpush1.bf16.msra.mxu0 %v1093_v57  ;;  %1156 = vmatprep.subr.bf16.mxu1 %v1155_v7  ;;  %v177_v36 = vld [vmem:[#allocation5 + $0x390] sm:$0xff]  ;;  %v184_v39 = vld [vmem:[#allocation5 + $0x3c8] sm:$0xff]  ;;  %v183_v43 = vld [vmem:[#allocation5 + $0x3c0] sm:$0xff]  ;;  %v1167_v44 = vpack.c.bf16 %v156_v38, %v150_v37 }
  0x50   :  { %1096 = vmatprep.subr.bf16.mxu0 %v1095_v62  ;;  %392 = vmatprep.mubr.f32.mxu0 %v1529_v34  ;;  %v1109_v42 = vpack.c.bf16 %v177_v36, %v171_v28  ;;  %v149_v45 = vld [vmem:[#allocation5 + $0x2b0] sm:$0xff]  ;;  %v155_v46 = vld [vmem:[#allocation5 + $0x2e0] sm:$0xff]  ;;  %v1111_v47 = vpack.c.bf16 %v190_v40, %v184_v39  ;;  %v162_v49 = vld [vmem:[#allocation5 + $0x318] sm:$0xff] }
  0x51   :  { %534 = vmatprep.mubr.f32.mxu1 %v1529_v34  ;;  %v189_v48 = vld [vmem:[#allocation5 + $0x3f0] sm:$0xff]  ;;  %v168_v50 = vld [vmem:[#allocation5 + $0x348] sm:$0xff]  ;;  %v202_v52 = vld [vmem:[#allocation5 + $0x458] sm:$0xff]  ;;  %v1169_v53 = vpack.c.bf16 %v155_v46, %v149_v45 }
  0x52   :  { %1158 = vmatpush1.bf16.msra.mxu1 %v1157_v16  ;;  %v196_v51 = vld [vmem:[#allocation5 + $0x428] sm:$0xff]  ;;  %v1113_v54 = vpack.c.bf16 %v189_v48, %v183_v43  ;;  %v195_v55 = vld [vmem:[#allocation5 + $0x420] sm:$0xff]  ;;  %v1171_v56 = vpack.c.bf16 %v168_v50, %v162_v49  ;;  %v161_v57 = vld [vmem:[#allocation5 + $0x310] sm:$0xff] }
  0x53   :  { %1098 = vmatpush1.bf16.msra.mxu0 %v1097_v5  ;;  %1160 = vmatprep.subr.bf16.mxu1 %v1159_v19  ;;  %v167_v58 = vld [vmem:[#allocation5 + $0x340] sm:$0xff]  ;;  %v1115_v59 = vpack.c.bf16 %v202_v52, %v196_v51  ;;  %v201_v60 = vld [vmem:[#allocation5 + $0x450] sm:$0xff]  ;;  %v174_v61 = vld [vmem:[#allocation5 + $0x378] sm:$0xff] }
  0x54   :  { %1100 = vmatprep.subr.bf16.mxu0 %v1099_v10  ;;  %v180_v62 = vld [vmem:[#allocation5 + $0x3a8] sm:$0xff]  ;;  %v214_v0 = vld [vmem:[#allocation5 + $0x4b8] sm:$0xff]  ;;  %v1173_v1 = vpack.c.bf16 %v167_v58, %v161_v57  ;;  %v1117_v2 = vpack.c.bf16 %v201_v60, %v195_v55  ;;  %v207_v3 = vld [vmem:[#allocation5 + $0x480] sm:$0xff] }
  0x55   :  { %v208_v63 = vld [vmem:[#allocation5 + $0x488] sm:$0xff]  ;;  %v1175_v4 = vpack.c.bf16 %v180_v62, %v174_v61  ;;  %v173_v5 = vld [vmem:[#allocation5 + $0x370] sm:$0xff]  ;;  %v179_v6 = vld [vmem:[#allocation5 + $0x3a0] sm:$0xff] }
  0x56   :  { %1162 = vmatpush1.bf16.msra.mxu1 %v1161_v29  ;;  %v1119_v7 = vpack.c.bf16 %v214_v0, %v208_v63  ;;  %v213_v8 = vld [vmem:[#allocation5 + $0x4b0] sm:$0xff]  ;;  %v186_v9 = vld [vmem:[#allocation5 + $0x3d8] sm:$0xff]  ;;  %v192_v10 = vld [vmem:[#allocation5 + $0x408] sm:$0xff]  ;;  %v1177_v13 = vpack.c.bf16 %v179_v6, %v173_v5 }
  0x57   :  { %1102 = vmatpush1.bf16.msra.mxu0 %v1101_v17  ;;  %1164 = vmatprep.subr.bf16.mxu1 %v1163_v31  ;;  %v220_v11 = vld [vmem:[#allocation5 + $0x4e8] sm:$0xff]  ;;  %v226_v12 = vld [vmem:[#allocation5 + $0x518] sm:$0xff]  ;;  %v1121_v14 = vpack.c.bf16 %v213_v8, %v207_v3  ;;  %v219_v15 = vld [vmem:[#allocation5 + $0x4e0] sm:$0xff]  ;;  %v1179_v16 = vpack.c.bf16 %v192_v10, %v186_v9  ;;  %v1461_v9 = vmov 0.0  }
  0x58   :  { %1104 = vmatprep.subr.bf16.mxu0 %v1103_v22  ;;  %v185_v17 = vld [vmem:[#allocation5 + $0x3d0] sm:$0xff]  ;;  %v191_v18 = vld [vmem:[#allocation5 + $0x400] sm:$0xff]  ;;  %v1123_v19 = vpack.c.bf16 %v226_v12, %v220_v11  ;;  %v198_v21 = vld [vmem:[#allocation5 + $0x438] sm:$0xff] }
  0x59   :  { %v225_v20 = vld [vmem:[#allocation5 + $0x510] sm:$0xff]  ;;  %v204_v22 = vld [vmem:[#allocation5 + $0x468] sm:$0xff]  ;;  %v238_v24 = vld [vmem:[#allocation5 + $0x578] sm:$0xff]  ;;  %v1181_v25 = vpack.c.bf16 %v191_v18, %v185_v17 }
  0x5a   :  { %1166 = vmatpush1.bf16.msra.mxu1 %v1165_v41  ;;  %v232_v23 = vld [vmem:[#allocation5 + $0x548] sm:$0xff]  ;;  %v1125_v26 = vpack.c.bf16 %v225_v20, %v219_v15  ;;  %v231_v27 = vld [vmem:[#allocation5 + $0x540] sm:$0xff]  ;;  %v1183_v28 = vpack.c.bf16 %v204_v22, %v198_v21  ;;  %v197_v29 = vld [vmem:[#allocation5 + $0x430] sm:$0xff] }
  0x5b   :  { %1106 = vmatpush1.bf16.msra.mxu0 %v1105_v30  ;;  %1168 = vmatprep.subr.bf16.mxu1 %v1167_v44  ;;  %v203_v30 = vld [vmem:[#allocation5 + $0x460] sm:$0xff]  ;;  %v1127_v31 = vpack.c.bf16 %v238_v24, %v232_v23  ;;  %v237_v32 = vld [vmem:[#allocation5 + $0x570] sm:$0xff]  ;;  %v210_v33 = vld [vmem:[#allocation5 + $0x498] sm:$0xff] }
  0x5c   :  { %1108 = vmatprep.subr.bf16.mxu0 %v1107_v35  ;;  %v216_v35 = vld [vmem:[#allocation5 + $0x4c8] sm:$0xff]  ;;  %v250_v37 = vld [vmem:[#allocation5 + $0x5d8] sm:$0xff]  ;;  %v1185_v38 = vpack.c.bf16 %v203_v30, %v197_v29  ;;  %v1129_v39 = vpack.c.bf16 %v237_v32, %v231_v27  ;;  %v243_v40 = vld [vmem:[#allocation5 + $0x5a0] sm:$0xff] }
  0x5d   :  { %v244_v36 = vld [vmem:[#allocation5 + $0x5a8] sm:$0xff]  ;;  %v1187_v41 = vpack.c.bf16 %v216_v35, %v210_v33  ;;  %v215_v43 = vld [vmem:[#allocation5 + $0x4c0] sm:$0xff]  ;;  %v249_v45 = vld [vmem:[#allocation5 + $0x5d0] sm:$0xff] }
  0x5e   :  { %1170 = vmatpush1.bf16.msra.mxu1 %v1169_v53  ;;  %v1131_v44 = vpack.c.bf16 %v250_v37, %v244_v36  ;;  %v222_v46 = vld [vmem:[#allocation5 + $0x4f8] sm:$0xff]  ;;  %v256_v48 = vld [vmem:[#allocation5 + $0x608] sm:$0xff]  ;;  %v1133_v51 = vpack.c.bf16 %v249_v45, %v243_v40  ;;  %v221_v53 = vld [vmem:[#allocation5 + $0x4f0] sm:$0xff] }
  0x5f   :  { %1110 = vmatpush1.bf16.msra.mxu0 %v1109_v42  ;;  %1172 = vmatprep.subr.bf16.mxu1 %v1171_v56  ;;  %v209_v42 = vld [vmem:[#allocation5 + $0x490] sm:$0xff]  ;;  %v262_v49 = vld [vmem:[#allocation5 + $0x638] sm:$0xff]  ;;  %v255_v56 = vld [vmem:[#allocation5 + $0x600] sm:$0xff] }
  0x60   :  { %1112 = vmatprep.subr.bf16.mxu0 %v1111_v47  ;;  %v228_v47 = vld [vmem:[#allocation5 + $0x528] sm:$0xff]  ;;  %v1189_v50 = vpack.c.bf16 %v215_v43, %v209_v42  ;;  %v1135_v55 = vpack.c.bf16 %v262_v49, %v256_v48  ;;  %v261_v57 = vld [vmem:[#allocation5 + $0x630] sm:$0xff]  ;;  %v234_v58 = vld [vmem:[#allocation5 + $0x558] sm:$0xff] }
  0x61   :  { %v1191_v52 = vpack.c.bf16 %v228_v47, %v222_v46  ;;  %v1533_v61 = vld [vmem:[#allocation2] sm:$0xff]  ;;  %v1137_v62 = vpack.c.bf16 %v261_v57, %v255_v56  ;;  %v233_v63 = vld [vmem:[#allocation5 + $0x550] sm:$0xff]  ;;  %v239_v0 = vld [vmem:[#allocation5 + $0x580] sm:$0xff] }
  0x62   :  { %1174 = vmatpush1.bf16.msra.mxu1 %v1173_v1  ;;  %v252_v3 = vld [vmem:[#allocation5 + $0x5e8] sm:$0xff]  ;;  %v74_v6 = vld [vmem:[#allocation5 + $0x58] sm:$0xff]  ;;  %v1197_v8 = vpack.c.bf16 %v239_v0, %v233_v63  ;;  %v67_v10 = vld [vmem:[#allocation5 + $0x20] sm:$0xff] }
  0x63   :  { %1114 = vmatpush1.bf16.msra.mxu0 %v1113_v54  ;;  %1176 = vmatprep.subr.bf16.mxu1 %v1175_v4  ;;  %v227_v54 = vld [vmem:[#allocation5 + $0x520] sm:$0xff]  ;;  %v268_v4 = vld [vmem:[#allocation5 + $0x668] sm:$0x1]  ;;  %v245_v12 = vld [vmem:[#allocation5 + $0x5b0] sm:$0xff] }
  0x64   :  { %1116 = vmatprep.subr.bf16.mxu0 %v1115_v59  ;;  %v240_v59 = vld [vmem:[#allocation5 + $0x588] sm:$0xff]  ;;  %v1193_v60 = vpack.c.bf16 %v227_v54, %v221_v53  ;;  %v73_v15 = vld [vmem:[#allocation5 + $0x50] sm:$0xff]  ;;  %v1539_v21 = vld [vmem:[#allocation2 + $0x10] sm:$0xff] }
  0x65   :  { %v1195_v1 = vpack.c.bf16 %v240_v59, %v234_v58  ;;  %v68_v5 = vld [vmem:[#allocation5 + $0x28] sm:$0xff]  ;;  %v1209_v22 = vpack.c.bf16 %v73_v15, %v67_v10  ;;  %v257_v24 = vld [vmem:[#allocation5 + $0x610] sm:$0xff]  ;;  %v79_v27 = vld [vmem:[#allocation5 + $0x80] sm:$0xff] }
  0x66   :  { %1178 = vmatpush1.bf16.msra.mxu1 %v1177_v13  ;;  %v251_v13 = vld [vmem:[#allocation5 + $0x5e0] sm:$0xff]  ;;  %v264_v17 = vld [vmem:[#allocation5 + $0x648] sm:$0xff]  ;;  %v98_v30 = vld [vmem:[#allocation5 + $0x118] sm:$0xff] }
  0x67   :  { %1118 = vmatpush1.bf16.msra.mxu0 %v1117_v2  ;;  %1180 = vmatprep.subr.bf16.mxu1 %v1179_v16  ;;  %v246_v2 = vld [vmem:[#allocation5 + $0x5b8] sm:$0xff]  ;;  %v80_v18 = vld [vmem:[#allocation5 + $0x88] sm:$0xff]  ;;  %v1201_v20 = vpack.c.bf16 %v251_v13, %v245_v12  ;;  %v91_v35 = vld [vmem:[#allocation5 + $0xe0] sm:$0xff] }
  0x68   :  { %1120 = vmatprep.subr.bf16.mxu0 %v1119_v7  ;;  %v267_v7 = vld [vmem:[#allocation5 + $0x660] sm:$0x1]  ;;  %v1199_v11 = vpack.c.bf16 %v252_v3, %v246_v2  ;;  %v258_v16 = vld [vmem:[#allocation5 + $0x618] sm:$0xff]  ;;  %v92_v29 = vld [vmem:[#allocation5 + $0xe8] sm:$0xff] }
  0x69   :  { %v1203_v23 = vpack.c.bf16 %v264_v17, %v258_v16  ;;  %v1215_v33 = vpack.c.bf16 %v98_v30, %v92_v29  ;;  %v97_v36 = vld [vmem:[#allocation5 + $0x110] sm:$0xff]  ;;  %v270_v37 = vld [vmem:[#allocation5 + $0x678] sm:$0x1]  ;;  %v103_v43 = vld [vmem:[#allocation5 + $0x140] sm:$0xff] }
  0x6a   :  { %1182 = vmatpush1.bf16.msra.mxu1 %v1181_v25  ;;  %v263_v25 = vld [vmem:[#allocation5 + $0x640] sm:$0xff]  ;;  %v1217_v40 = vpack.c.bf16 %v97_v36, %v91_v35  ;;  %v116_v45 = vld [vmem:[#allocation5 + $0x1a8] sm:$0xff]  ;;  %v122_v46 = vld [vmem:[#allocation5 + $0x1d8] sm:$0xff] }
  0x6b   :  { %1122 = vmatpush1.bf16.msra.mxu0 %v1121_v14  ;;  %1184 = vmatprep.subr.bf16.mxu1 %v1183_v28  ;;  %v1207_v14 = vpack.c.bf16 %v74_v6, %v68_v5  ;;  %v85_v28 = vld [vmem:[#allocation5 + $0xb0] sm:$0xff]  ;;  %v1223_v47 = vpack.c.bf16 %v122_v46, %v116_v45  ;;  %v115_v48 = vld [vmem:[#allocation5 + $0x1a0] sm:$0xff]  ;;  %v140_v56 = vld [vmem:[#allocation5 + $0x268] sm:$0xff] }
  0x6c   :  { %1124 = vmatprep.subr.bf16.mxu0 %v1123_v19  ;;  %v86_v19 = vld [vmem:[#allocation5 + $0xb8] sm:$0xff]  ;;  %v1213_v32 = vpack.c.bf16 %v85_v28, %v79_v27  ;;  %v121_v49 = vld [vmem:[#allocation5 + $0x1d0] sm:$0xff]  ;;  %v127_v54 = vld [vmem:[#allocation5 + $0x200] sm:$0xff] }
  0x6d   :  { %v146_v57 = vld [vmem:[#allocation5 + $0x298] sm:$0xff]  ;;  %v152_v63 = vld [vmem:[#allocation5 + $0x2c8] sm:$0xff]  ;;  %v151_v3 = vld [vmem:[#allocation5 + $0x2c0] sm:$0xff] }
  0x6e   :  { %1186 = vmatpush1.bf16.msra.mxu1 %v1185_v38  ;;  %v104_v38 = vld [vmem:[#allocation5 + $0x148] sm:$0xff]  ;;  %v1231_v59 = vpack.c.bf16 %v146_v57, %v140_v56  ;;  %v158_v0 = vld [vmem:[#allocation5 + $0x2f8] sm:$0xff]  ;;  %v163_v10 = vld [vmem:[#allocation5 + $0x320] sm:$0xff] }
  0x6f   :  { %1126 = vmatpush1.bf16.msra.mxu0 %v1125_v26  ;;  %1188 = vmatprep.subr.bf16.mxu1 %v1187_v41  ;;  %v1211_v26 = vpack.c.bf16 %v86_v19, %v80_v18  ;;  %v269_v41 = vld [vmem:[#allocation5 + $0x670] sm:$0x1]  ;;  %v1235_v2 = vpack.c.bf16 %v158_v0, %v152_v63  ;;  %v164_v5 = vld [vmem:[#allocation5 + $0x328] sm:$0xff]  ;;  %v170_v6 = vld [vmem:[#allocation5 + $0x358] sm:$0xff] }
  0x70   :  { %1128 = vmatprep.subr.bf16.mxu0 %v1127_v31  ;;  %v1205_v31 = vpack.c.bf16 %v263_v25, %v257_v24  ;;  %v176_v12 = vld [vmem:[#allocation5 + $0x388] sm:$0xff]  ;;  %v182_v13 = vld [vmem:[#allocation5 + $0x3b8] sm:$0xff]  ;;  %v175_v16 = vld [vmem:[#allocation5 + $0x380] sm:$0xff] }
  0x71   :  { %v1243_v15 = vpack.c.bf16 %v182_v13, %v176_v12  ;;  %v181_v17 = vld [vmem:[#allocation5 + $0x3b0] sm:$0xff]  ;;  %v188_v18 = vld [vmem:[#allocation5 + $0x3e8] sm:$0xff]  ;;  %v194_v19 = vld [vmem:[#allocation5 + $0x418] sm:$0xff] }
  0x72   :  { %1190 = vmatpush1.bf16.msra.mxu1 %v1189_v50  ;;  %v128_v50 = vld [vmem:[#allocation5 + $0x208] sm:$0xff]  ;;  %v193_v24 = vld [vmem:[#allocation5 + $0x410] sm:$0xff]  ;;  %v199_v29 = vld [vmem:[#allocation5 + $0x440] sm:$0xff] }
  0x73   :  { %1130 = vmatpush1.bf16.msra.mxu0 %v1129_v39  ;;  %1192 = vmatprep.subr.bf16.mxu1 %v1191_v52  ;;  %v110_v39 = vld [vmem:[#allocation5 + $0x178] sm:$0xff]  ;;  %v1225_v52 = vpack.c.bf16 %v121_v49, %v115_v48  ;;  %v200_v25 = vld [vmem:[#allocation5 + $0x448] sm:$0xff]  ;;  %v205_v30 = vld [vmem:[#allocation5 + $0x470] sm:$0xff] }
  0x74   :  { %1132 = vmatprep.subr.bf16.mxu0 %v1131_v44  ;;  %v1219_v42 = vpack.c.bf16 %v110_v39, %v104_v38  ;;  %v109_v44 = vld [vmem:[#allocation5 + $0x170] sm:$0xff]  ;;  %v211_v36 = vld [vmem:[#allocation5 + $0x4a0] sm:$0xff]  ;;  %v224_v38 = vld [vmem:[#allocation5 + $0x508] sm:$0xff] }
  0x75   :  { %v230_v39 = vld [vmem:[#allocation5 + $0x538] sm:$0xff]  ;;  %v241_v48 = vld [vmem:[#allocation5 + $0x590] sm:$0xff]  ;;  %v248_v49 = vld [vmem:[#allocation5 + $0x5c8] sm:$0xff] }
  0x76   :  { %1194 = vmatpush1.bf16.msra.mxu1 %v1193_v60  ;;  %v139_v60 = vld [vmem:[#allocation5 + $0x260] sm:$0xff]  ;;  %v242_v45 = vld [vmem:[#allocation5 + $0x598] sm:$0xff]  ;;  %v272_v63 = vld [vmem:[#allocation5 + $0x688] sm:$0x1] }
  0x77   :  { %1134 = vmatpush1.bf16.msra.mxu0 %v1133_v51  ;;  %1196 = vmatprep.subr.bf16.mxu1 %v1195_v1  ;;  %v134_v51 = vld [vmem:[#allocation5 + $0x238] sm:$0xff]  ;;  %v271_v0 = vld [vmem:[#allocation5 + $0x680] sm:$0x1] }
  0x78   :  { %1136 = vmatprep.subr.bf16.mxu0 %v1135_v55  ;;  %v1227_v53 = vpack.c.bf16 %v134_v51, %v128_v50  ;;  %v133_v55 = vld [vmem:[#allocation5 + $0x230] sm:$0xff]  ;;  %v254_v50 = vld [vmem:[#allocation5 + $0x5f8] sm:$0xff] }
  0x79   :  { %v1229_v58 = vpack.c.bf16 %v133_v55, %v127_v54  ;;  %v253_v54 = vld [vmem:[#allocation5 + $0x5f0] sm:$0xff]  ;;  %v260_v55 = vld [vmem:[#allocation5 + $0x628] sm:$0xff]  ;;  %v266_v56 = vld [vmem:[#allocation5 + $0x658] sm:$0xff] }
  0x7a   :  { %393 = vmatmul.mubr.f32.vlgmr.msra.gmra.mrb[0].mxu0 %v1533_v61  ;;  %1198 = vmatpush1.bf16.msra.mxu1 %v1197_v8  ;;  %v1239_v8 = vpack.c.bf16 %v170_v6, %v164_v5  ;;  %v761_v5 = vld [vmem:[#allocation7 + $0x8] sm:$0xff] }
  0x7b   :  { %1138 = vmatpush1.bf16.msra.mxu0 %v1137_v62  ;;  %463 = vmatprep.mubr.f32.mxu0 %v1461_v9  ;;  %v145_v62 = vld [vmem:[#allocation5 + $0x290] sm:$0xff]  ;;  %v781_v12 = vld [vmem:[#allocation7 + $0xa8] sm:$0xff] }
  0x7c   :  { %991 = vmatprep.subr.msk.mxu0 %vm309_vm0, %v268_v4  ;;  %1200 = vmatprep.subr.bf16.mxu1 %v1199_v11  ;;  %v1233_v1 = vpack.c.bf16 %v145_v62, %v139_v60  ;;  %v157_v4 = vld [vmem:[#allocation5 + $0x2f0] sm:$0xff] }
  0x7d   :  { %v169_v11 = vld [vmem:[#allocation5 + $0x350] sm:$0xff] }
  0x7e   :  { %1202 = vmatpush1.bf16.msra.mxu1 %v1201_v20  ;;  %v1245_v20 = vpack.c.bf16 %v181_v17, %v175_v16  ;;  %v265_v60 = vld [vmem:[#allocation5 + $0x650] sm:$0xff]  ;;  %v765_v16 = vld [vmem:[#allocation7 + $0x28] sm:$0xff]  ;;  %v783_v17 = vld [vmem:[#allocation7 + $0xb8] sm:$0xff] }
  0x7f   :  { %992 = vmatpush1.msk.msra.mxu0 %vm309_vm0, %v267_v7  ;;  %1204 = vmatprep.subr.bf16.mxu1 %v1203_v23  ;;  %v1237_v7 = vpack.c.bf16 %v157_v4, %v151_v3  ;;  %v187_v23 = vld [vmem:[#allocation5 + $0x3e0] sm:$0xff]  ;;  %v760_v4 = vld [vmem:[#allocation7] sm:$0xff] }
  0x80   :  { %1208 = vmatprep.subr.bf16.mxu0 %v1207_v14  ;;  %v1241_v14 = vpack.c.bf16 %v169_v11, %v163_v10  ;;  %v1249_v27 = vpack.c.bf16 %v193_v24, %v187_v23  ;;  %v1277_v6 = vpack.c.bf16 %v761_v5, %v760_v4  ;;  %v763_v10 = vld [vmem:[#allocation7 + $0x18] sm:$0xff]  ;;  %v780_v11 = vld [vmem:[#allocation7 + $0xa0] sm:$0xff]  ;;  %v785_v24 = vld [vmem:[#allocation7 + $0xc8] sm:$0xff] }
  0x81   :  { %535 = vmatmul.mubr.f32.vlgmr.msra.gmra.mrb[0].mxu1 %v1533_v61  ;;  %v784_v23 = vld [vmem:[#allocation7 + $0xc0] sm:$0xff] }
  0x82   :  { %993 = vmatmul.mubr.msk.f32.vlgmr.msra.gmra.mrb[0].mxu0 %vm305_vm1, %v1539_v21  ;;  %1206 = vmatpush1.bf16.msra.mxu1 %v1205_v31  ;;  %v212_v31 = vld [vmem:[#allocation5 + $0x4a8] sm:$0xff] }
  0x83   :  { %1210 = vmatpush1.bf16.msra.mxu0 %v1209_v22  ;;  %676 = vmatprep.mubr.f32.mxu0 %v1529_v34  ;;  %v1221_v34 = vpack.c.bf16 %v109_v44, %v103_v43  ;;  %v1247_v22 = vpack.c.bf16 %v194_v19, %v188_v18  ;;  %v229_v43 = vld [vmem:[#allocation5 + $0x530] sm:$0xff]  ;;  %v236_v44 = vld [vmem:[#allocation5 + $0x568] sm:$0xff] }
  0x84   :  { %1212 = vmatprep.subr.bf16.mxu0 %v1211_v26  ;;  %605 = vmatprep.mubr.f32.mxu1 %v1461_v9  ;;  %v206_v26 = vld [vmem:[#allocation5 + $0x478] sm:$0xff] }
  0x85   :  { %994 = vmatprep.subr.msk.mxu1 %vm309_vm0, %v270_v37  ;;  %v1251_v28 = vpack.c.bf16 %v206_v26, %v200_v25  ;;  %v217_v37 = vld [vmem:[#allocation5 + $0x4d0] sm:$0xff]  ;;  %v1291_v26 = vpack.c.bf16 %v785_v24, %v784_v23  ;;  %v797_v23 = vld [vmem:[#allocation7 + $0x128] sm:$0xff]  ;;  %v814_v24 = vld [vmem:[#allocation7 + $0x1b0] sm:$0xff] }
  0x86   :  { %995 = vmatpush1.msk.msra.mxu1 %vm309_vm0, %v269_v41  ;;  %v1259_v41 = vpack.c.bf16 %v230_v39, %v224_v38 }
  0x87   :  { %1214 = vmatpush1.bf16.msra.mxu0 %v1213_v32  ;;  %v218_v32 = vld [vmem:[#allocation5 + $0x4d8] sm:$0xff] }
  0x88   :  { %1216 = vmatprep.subr.bf16.mxu0 %v1215_v33  ;;  %v1253_v33 = vpack.c.bf16 %v205_v30, %v199_v29  ;;  %v1255_v35 = vpack.c.bf16 %v218_v32, %v212_v31  ;;  %v786_v29 = vld [vmem:[#allocation7 + $0xd0] sm:$0xff]  ;;  %v787_v30 = vld [vmem:[#allocation7 + $0xd8] sm:$0xff] }
  0x89   :  { %996 = vmatmul.mubr.msk.f32.vlgmr.msra.gmra.mrb[0].mxu1 %vm305_vm1, %v1539_v21  ;;  %v1295_v32 = vpack.c.bf16 %v787_v30, %v786_v29  ;;  %v799_v29 = vld [vmem:[#allocation7 + $0x138] sm:$0xff]  ;;  %v816_v30 = vld [vmem:[#allocation7 + $0x1c0] sm:$0xff] }
  0x8b   :  { %1218 = vmatpush1.bf16.msra.mxu0 %v1217_v40  ;;  %v1257_v40 = vpack.c.bf16 %v217_v37, %v211_v36  ;;  %v788_v36 = vld [vmem:[#allocation7 + $0xe0] sm:$0xff]  ;;  %v789_v37 = vld [vmem:[#allocation7 + $0xe8] sm:$0xff] }
  0x8c   :  { %1220 = vmatprep.subr.bf16.mxu0 %v1219_v42  ;;  %v223_v42 = vld [vmem:[#allocation5 + $0x500] sm:$0xff]  ;;  %v1299_v39 = vpack.c.bf16 %v789_v37, %v788_v36  ;;  %v801_v36 = vld [vmem:[#allocation7 + $0x148] sm:$0xff] }
  0x8d   :  { %v1261_v46 = vpack.c.bf16 %v229_v43, %v223_v42  ;;  %v790_v42 = vld [vmem:[#allocation7 + $0xf0] sm:$0xff]  ;;  %v791_v43 = vld [vmem:[#allocation7 + $0xf8] sm:$0xff] }
  0x8e   :  { %v818_v37 = vld [vmem:[#allocation7 + $0x1d0] sm:$0xff] }
  0x8f   :  { %1222 = vmatpush1.bf16.msra.mxu0 %v1221_v34  ;;  %v1263_v34 = vpack.c.bf16 %v242_v45, %v236_v44  ;;  %v1303_v45 = vpack.c.bf16 %v791_v43, %v790_v42  ;;  %v803_v42 = vld [vmem:[#allocation7 + $0x158] sm:$0xff]  ;;  %v820_v43 = vld [vmem:[#allocation7 + $0x1e0] sm:$0xff] }
  0x90   :  { %1224 = vmatprep.subr.bf16.mxu0 %v1223_v47  ;;  %v235_v47 = vld [vmem:[#allocation5 + $0x560] sm:$0xff] }
  0x91   :  { %v1265_v51 = vpack.c.bf16 %v241_v48, %v235_v47  ;;  %v808_v47 = vld [vmem:[#allocation7 + $0x180] sm:$0xff]  ;;  %v809_v48 = vld [vmem:[#allocation7 + $0x188] sm:$0xff] }
  0x93   :  { %1226 = vmatpush1.bf16.msra.mxu0 %v1225_v52  ;;  %v1267_v52 = vpack.c.bf16 %v254_v50, %v248_v49  ;;  %v1307_v50 = vpack.c.bf16 %v809_v48, %v808_v47  ;;  %v805_v47 = vld [vmem:[#allocation7 + $0x168] sm:$0xff]  ;;  %v822_v48 = vld [vmem:[#allocation7 + $0x1f0] sm:$0xff] }
  0x94   :  { %1228 = vmatprep.subr.bf16.mxu0 %v1227_v53  ;;  %v247_v53 = vld [vmem:[#allocation5 + $0x5c0] sm:$0xff] }
  0x95   :  { %v1269_v57 = vpack.c.bf16 %v253_v54, %v247_v53  ;;  %v1562_v54 = vld [vmem:[%s1592_s2] sm:$0x3f] }
  0x97   :  { %1230 = vmatpush1.bf16.msra.mxu0 %v1229_v58  ;;  %v1271_v58 = vpack.c.bf16 %v266_v56, %v260_v55 }
  0x98   :  { %1232 = vmatprep.subr.bf16.mxu0 %v1231_v59  ;;  %v259_v59 = vld [vmem:[#allocation5 + $0x620] sm:$0xff] }
  0x99   :  { %v1273_v62 = vpack.c.bf16 %v265_v60, %v259_v59 }
  0x9b   :  { %1234 = vmatpush1.bf16.msra.mxu0 %v1233_v1  ;;  %v776_v1 = vld [vmem:[#allocation7 + $0x80] sm:$0xff] }
  0x9c   :  { %1236 = vmatprep.subr.bf16.mxu0 %v1235_v2  ;;  %v777_v2 = vld [vmem:[#allocation7 + $0x88] sm:$0xff] }
  0x9d   :  { %v1275_v3 = vpack.c.bf16 %v777_v2, %v776_v1 }
  0x9f   :  { %1238 = vmatpush1.bf16.msra.mxu0 %v1237_v7  ;;  %1276 = vmatprep.subr.bf16.mxu1 %v1275_v3  ;;  %v779_v7 = vld [vmem:[#allocation7 + $0x98] sm:$0xff] }
  0xa0   :  { %1240 = vmatprep.subr.bf16.mxu0 %v1239_v8  ;;  %1278 = vmatpush3.bf16.msra.mxu1 %v1277_v6  ;;  %v762_v8 = vld [vmem:[#allocation7 + $0x10] sm:$0xff] }
  0xa1   :  { %v1281_v13 = vpack.c.bf16 %v763_v10, %v762_v8  ;;  %v793_v8 = vld [vmem:[#allocation7 + $0x108] sm:$0xff]  ;;  %v810_v10 = vld [vmem:[#allocation7 + $0x190] sm:$0xff] }
  0xa3   :  { %1242 = vmatpush1.bf16.msra.mxu0 %v1241_v14  ;;  %v1283_v14 = vpack.c.bf16 %v781_v12, %v780_v11  ;;  %v811_v11 = vld [vmem:[#allocation7 + $0x198] sm:$0xff] }
  0xa4   :  { %1244 = vmatprep.subr.bf16.mxu0 %v1243_v15  ;;  %v764_v15 = vld [vmem:[#allocation7 + $0x20] sm:$0xff] }
  0xa5   :  { %v1285_v18 = vpack.c.bf16 %v765_v16, %v764_v15  ;;  %v1311_v15 = vpack.c.bf16 %v811_v11, %v810_v10  ;;  %v794_v16 = vld [vmem:[#allocation7 + $0x110] sm:$0xff] }
  0xa7   :  { %1246 = vmatpush1.bf16.msra.mxu0 %v1245_v20  ;;  %v766_v20 = vld [vmem:[#allocation7 + $0x30] sm:$0xff] }
  0xa8   :  { %1248 = vmatprep.subr.bf16.mxu0 %v1247_v22  ;;  %v767_v22 = vld [vmem:[#allocation7 + $0x38] sm:$0xff] }
  0xa9   :  { %v1289_v25 = vpack.c.bf16 %v767_v22, %v766_v20  ;;  %v796_v22 = vld [vmem:[#allocation7 + $0x120] sm:$0xff] }
  0xab   :  { %1250 = vmatpush1.bf16.msra.mxu0 %v1249_v27  ;;  %v768_v27 = vld [vmem:[#allocation7 + $0x40] sm:$0xff] }
  0xac   :  { %1252 = vmatprep.subr.bf16.mxu0 %v1251_v28  ;;  %v769_v28 = vld [vmem:[#allocation7 + $0x48] sm:$0xff] }
  0xad   :  { %v1293_v31 = vpack.c.bf16 %v769_v28, %v768_v27  ;;  %v798_v28 = vld [vmem:[#allocation7 + $0x130] sm:$0xff] }
  0xaf   :  { %1254 = vmatpush1.bf16.msra.mxu0 %v1253_v33  ;;  %v770_v33 = vld [vmem:[#allocation7 + $0x50] sm:$0xff] }
  0xb0   :  { %1256 = vmatprep.subr.bf16.mxu0 %v1255_v35  ;;  %v771_v35 = vld [vmem:[#allocation7 + $0x58] sm:$0xff] }
  0xb1   :  { %v1297_v38 = vpack.c.bf16 %v771_v35, %v770_v33  ;;  %v800_v35 = vld [vmem:[#allocation7 + $0x140] sm:$0xff] }
  0xb3   :  { %1258 = vmatpush1.bf16.msra.mxu0 %v1257_v40  ;;  %v772_v40 = vld [vmem:[#allocation7 + $0x60] sm:$0xff] }
  0xb4   :  { %1260 = vmatprep.subr.bf16.mxu0 %v1259_v41  ;;  %v773_v41 = vld [vmem:[#allocation7 + $0x68] sm:$0xff] }
  0xb5   :  { %v1301_v44 = vpack.c.bf16 %v773_v41, %v772_v40  ;;  %v802_v41 = vld [vmem:[#allocation7 + $0x150] sm:$0xff] }
  0xb7   :  { %1262 = vmatpush1.bf16.msra.mxu0 %v1261_v46  ;;  %v774_v46 = vld [vmem:[#allocation7 + $0x70] sm:$0xff] }
  0xb8   :  { %1264 = vmatprep.subr.bf16.mxu0 %v1263_v34  ;;  %v775_v34 = vld [vmem:[#allocation7 + $0x78] sm:$0xff] }
  0xb9   :  { %v1305_v49 = vpack.c.bf16 %v775_v34, %v774_v46  ;;  %v804_v34 = vld [vmem:[#allocation7 + $0x160] sm:$0xff] }
  0xbb   :  { %1266 = vmatpush1.bf16.msra.mxu0 %v1265_v51  ;;  %v275_v51 = vlaneseq }
  0xbc   :  { %1268 = vmatprep.subr.bf16.mxu0 %v1267_v52 }
  0xbd   :  { %v1556_v52 = vshrl.u32 %v275_v51, 7 }
  0xbf   :  { %1270 = vmatpush1.bf16.msra.mxu0 %v1269_v57  ;;  %v277_v53 = vsub.s32 0, %v1556_v52  ;;  %v281_v55 = vsub.s32 1, %v1556_v52  ;;  %v285_v1 = vsub.s32 2, %v1556_v52  ;;  %v289_v2 = vsub.s32 3, %v1556_v52 }
  0xc0   :  { %1272 = vmatprep.subr.bf16.mxu0 %v1271_v58 }
  0xc1   :  { %v278_v56 = vrot.slane %v1562_v54, %v277_v53  ;;  %v282_v57 = vrot.slane %v1562_v54, %v281_v55  ;;  %v286_v3 = vrot.slane %v1562_v54, %v285_v1  ;;  %v290_v4 = vrot.slane %v1562_v54, %v289_v2  ;;  %v806_v53 = vld [vmem:[#allocation7 + $0x170] sm:$0xff]  ;;  %v807_v55 = vld [vmem:[#allocation7 + $0x178] sm:$0xff] }
  0xc2   :  { %677 = vmatmul.mubr.f32.vlgmr.msra.gmra.mrb[2].mxu0 %v1533_v61  ;;  %v778_v61 = vld [vmem:[#allocation7 + $0x90] sm:$0xff] }
  0xc3   :  { %1274 = vmatpush1.bf16.msra.mxu0 %v1273_v62  ;;  %747 = vmatprep.mubr.f32.mxu0 %v1461_v9  ;;  %v1279_v9 = vpack.c.bf16 %v779_v7, %v778_v61  ;;  %v792_v7 = vld [vmem:[#allocation7 + $0x100] sm:$0xff] }
  0xc4   :  { %997 = vmatprep.subr.msk.mxu0 %vm309_vm0, %v272_v63 }
  0xc5   :  { %1280 = vmatprep.subr.bf16.mxu1 %v1279_v9 }
  0xc6   :  { %1282 = vmatpush3.bf16.msra.mxu1 %v1281_v13 }
  0xc7   :  { %998 = vmatpush1.msk.msra.mxu0 %vm309_vm0, %v271_v0  ;;  %1284 = vmatprep.subr.bf16.mxu1 %v1283_v14  ;;  %v1309_v14 = vpack.c.bf16 %v793_v8, %v792_v7 }
  0xca   :  { %999 = vmatmul.mubr.msk.f32.vlgmr.msra.gmra.mrb[2].mxu0 %vm305_vm1, %v1539_v21  ;;  %v782_v21 = vld [vmem:[#allocation7 + $0xb0] sm:$0xff]  ;;  %1286 = vmatpush3.bf16.msra.mxu1 %v1285_v18  ;;  %v813_v18 = vld [vmem:[#allocation7 + $0x1a8] sm:$0xff] }
  0xcb   :  { %v1287_v19 = vpack.c.bf16 %v783_v17, %v782_v21  ;;  %v795_v21 = vld [vmem:[#allocation7 + $0x118] sm:$0xff]  ;;  %v812_v17 = vld [vmem:[#allocation7 + $0x1a0] sm:$0xff] }
  0xcc   :  { %v1315_v20 = vpack.c.bf16 %v813_v18, %v812_v17 }
  0xcd   :  { %1288 = vmatprep.subr.bf16.mxu1 %v1287_v19  ;;  %v1313_v19 = vpack.c.bf16 %v795_v21, %v794_v16 }
  0xce   :  { %1290 = vmatpush3.bf16.msra.mxu1 %v1289_v25  ;;  %v815_v25 = vld [vmem:[#allocation7 + $0x1b8] sm:$0xff] }
  0xcf   :  { %1292 = vmatprep.subr.bf16.mxu1 %v1291_v26  ;;  %v1317_v26 = vpack.c.bf16 %v797_v23, %v796_v22  ;;  %v1319_v27 = vpack.c.bf16 %v815_v25, %v814_v24 }
  0xd2   :  { %1294 = vmatpush3.bf16.msra.mxu1 %v1293_v31  ;;  %v817_v31 = vld [vmem:[#allocation7 + $0x1c8] sm:$0xff] }
  0xd3   :  { %1296 = vmatprep.subr.bf16.mxu1 %v1295_v32  ;;  %v1321_v32 = vpack.c.bf16 %v799_v29, %v798_v28  ;;  %v1323_v33 = vpack.c.bf16 %v817_v31, %v816_v30 }
  0xd6   :  { %1298 = vmatpush3.bf16.msra.mxu1 %v1297_v38  ;;  %v819_v38 = vld [vmem:[#allocation7 + $0x1d8] sm:$0xff] }
  0xd7   :  { %1300 = vmatprep.subr.bf16.mxu1 %v1299_v39  ;;  %v1325_v39 = vpack.c.bf16 %v801_v36, %v800_v35  ;;  %v1327_v40 = vpack.c.bf16 %v819_v38, %v818_v37 }
  0xda   :  { %1302 = vmatpush3.bf16.msra.mxu1 %v1301_v44  ;;  %v821_v44 = vld [vmem:[#allocation7 + $0x1e8] sm:$0xff] }
  0xdb   :  { %1304 = vmatprep.subr.bf16.mxu1 %v1303_v45  ;;  %v1329_v45 = vpack.c.bf16 %v803_v42, %v802_v41  ;;  %v1331_v46 = vpack.c.bf16 %v821_v44, %v820_v43 }
  0xde   :  { %1306 = vmatpush3.bf16.msra.mxu1 %v1305_v49  ;;  %v823_v49 = vld [vmem:[#allocation7 + $0x1f8] sm:$0xff] }
  0xdf   :  { %1308 = vmatprep.subr.bf16.mxu1 %v1307_v50  ;;  %v1333_v50 = vpack.c.bf16 %v805_v47, %v804_v34  ;;  %v1335_v51 = vpack.c.bf16 %v823_v49, %v822_v48 }
 0x155   :  { %v465_v58 = vpop.f32.mrb[0].mxu0 }
 0x156   :  { %v1339_v59 = vadd.f32 %v465_v58, %v278_v56  ;;  %v467_v60 = vpop.f32.mrb[1].mxu0  ;;  %v1337_v56 = vpack.c.bf16 %v807_v55, %v806_v53  ;;  %v297_v58 = vsub.s32 5, %v1556_v52 }
 0x157   :  { %v1340_v62 = vadd.f32 %v467_v60, %v282_v57  ;;  %v293_v57 = vsub.s32 4, %v1556_v52 }
 0x158   :  { %v754_v63 = vmax.f32 %v1339_v59, 0.0  ;;  %v298_v60 = vrot.slane %v1562_v54, %v297_v58 }
 0x159   :  { %v755_v0 = vmax.f32 %v1340_v62, 0.0  ;;  %v294_v59 = vrot.slane %v1562_v54, %v293_v57 }
 0x15a   :  { %972 = vst [vmem:[#allocation8] sm:$0xff] %v754_v63 }
 0x15b   :  { %973 = vst [vmem:[#allocation8 + $0x8] sm:$0xff] %v755_v0 }
 0x15c   :  { %v607_v5 = vpop.f32.mrb[0].mxu1 }
 0x15d   :  { %v1341_v6 = vadd.f32 %v607_v5, %v286_v3  ;;  %v609_v61 = vpop.f32.mrb[1].mxu1 }
 0x15e   :  { %v1342_v9 = vadd.f32 %v609_v61, %v290_v4  ;;  %v1000_v61 = vld [vmem:[%s1594_s4] ss:$0 sm:$0xff] }
 0x15f   :  { %v756_v12 = vmax.f32 %v1341_v6, 0.0 }
 0x160   :  { %v757_v13 = vmax.f32 %v1342_v9, 0.0 }
 0x162   :  { %895 = vmatprep.mubr.f32.mxu1 %v757_v13 }
 0x163   :  { %896 = vmatmul.mubr.f32.vlgmr.msra.gmra.mrb[2].mxu1 %v756_v12 }
 0x164   :  { %1310 = vmatpush3.bf16.msra.mxu1 %v1309_v14 }
 0x165   :  { %1312 = vmatprep.subr.bf16.mxu1 %v1311_v15 }
 0x168   :  { %1314 = vmatpush3.bf16.msra.mxu1 %v1313_v19 }
 0x169   :  { %1316 = vmatprep.subr.bf16.mxu1 %v1315_v20 }
 0x16c   :  { %1318 = vmatpush3.bf16.msra.mxu1 %v1317_v26 }
 0x16d   :  { %1320 = vmatprep.subr.bf16.mxu1 %v1319_v27 }
 0x170   :  { %1322 = vmatpush3.bf16.msra.mxu1 %v1321_v32 }
 0x171   :  { %1324 = vmatprep.subr.bf16.mxu1 %v1323_v33 }
 0x174   :  { %1326 = vmatpush3.bf16.msra.mxu1 %v1325_v39 }
 0x175   :  { %1328 = vmatprep.subr.bf16.mxu1 %v1327_v40 }
 0x178   :  { %1330 = vmatpush3.bf16.msra.mxu1 %v1329_v45 }
 0x179   :  { %1332 = vmatprep.subr.bf16.mxu1 %v1331_v46 }
 0x17c   :  { %1334 = vmatpush3.bf16.msra.mxu1 %v1333_v50 }
 0x17d   :  { %1336 = vmatprep.subr.bf16.mxu1 %v1335_v51 }
 0x180   :  { %1338 = vmatpush3.bf16.msra.mxu1 %v1337_v56 }
 0x19d   :  { %v749_v62 = vpop.f32.mrb[2].mxu0 }
 0x19e   :  { %v1343_v63 = vadd.f32 %v749_v62, %v294_v59  ;;  %v751_v0 = vpop.f32.mrb[3].mxu0 }
 0x19f   :  { %v1344_v1 = vadd.f32 %v751_v0, %v298_v60 }
 0x1a0   :  { %v758_v3 = vmax.f32 %v1343_v63, 0.0 }
 0x1a1   :  { %v759_v2 = vmax.f32 %v1344_v1, 0.0 }
 0x1a3   :  { %965 = vmatprep.mubr.f32.mxu1 %v759_v2 }
 0x1a4   :  { %966 = vmatmul.mubr.f32.vlgmr.msra.gmra.mrb[4].mxu1 %v758_v3 }
 0x236   :  { %v1033_v4 = vpop.f32.mrb[2].mxu1 }
 0x237   :  { %v1034_v5 = vpop.f32.mrb[3].mxu1 }
 0x238   :  { %v1035_v6 = vadd.f32 %v1034_v5, %v1033_v4 }
 0x23a   :  { %v898_v8 = vadd.f32 %v1035_v6, %v1000_v61 }
 0x277   :  { %v1068_v52 = vpop.f32.mrb[4].mxu1 }
 0x278   :  { %v1069_v7 = vpop.f32.mrb[5].mxu1 }
 0x279   :  { %v1070_v9 = vadd.f32 %v1069_v7, %v1068_v52 }
 0x27b   :  { %v968_v54 = vadd.f32 %v1070_v9, %v898_v8 }
 0x27d   :  { %v971_v10 = vmax.f32 %v968_v54, 0.0 }
 0x27f   :  { %974 = vst [vmem:[#allocation8 + $0x10] sm:$0xff] %v971_v10 }
 0x280   :  { %1437 = shalt.err (!%p1434_p0)
}
 0x281   :  { %s1438_s4 = scalar_lea.hbm %s1595_s5, 384 }
 0x282   :  { %p1439_p1 = scmp.ne.s32.totalorder %s1595_s5, %s1438_s4  ;;  %p1442_p2 = scmp.lt.u32.totalorder %s1438_s4, %s1595_s5 }
 0x284   :  { %p1444_p3 = pnand %p1442_p2, %p1439_p1 }
 0x286   :  { %1447 = shalt.err (!%p1444_p3)
}
 0x287   :  { %984 = dma.vmem_to_hbm [thread:$0]  %s982_s9, 384, %s1595_s5, [#allocation4]  }
 0x288   :  { %1452 = dma.done.wait [#allocation4], 384  }
 0x289   :  { %1453 = vsyncadd [#allocation4], 4294966912 }
 0x28a   :  { %988 = vsyncpa [#allocation3], 1 }
 0x28b   :  { %989 = vsyncpa [#allocation6], 1 }
 0x28c   :  { %990 = vsyncpa [#allocation4], 1 }

</bundles_post_ra>
